<compile_context>
chip_gen: v7x
topology: tpu7x:2x2x1
jax: 0.10.0
libtpu: 0.0.40
codegen_flags: <defaults>
</compile_context>

<pallas_src>
import jax
import jax.numpy as jnp
from jax import lax
from jax.experimental import pallas as pl
from jax.experimental.pallas import tpu as pltpu

_LANE = 128
_SUBLANE = 8


def _round_up(x, m):
    return (x + m - 1) // m * m


def _pad_to(x, shape):
    pads = [(0, t - s) for s, t in zip(x.shape, shape)]
    return jnp.pad(x, pads)


def _one_hot_counts(ids_ref, num_classes_padded):
    """counts[b, v] = #{s : ids[b, s] == v}   (float32, lane-dense)."""
    tile_b, seq = ids_ref.shape
    iota = lax.broadcasted_iota(jnp.int32, (tile_b, num_classes_padded), 1)
    counts = jnp.zeros((tile_b, num_classes_padded), jnp.float32)
    # NOTE: seq (S or P) is small & static here; the loop unrolls into a few
    # lane-broadcast compares + VPU adds.
    for s in range(seq):
        col = ids_ref[:, s:s + 1]                      # (tile_b, 1) int32
        counts = counts + (col == iota).astype(jnp.float32)
    return counts


def _classifier_kernel(tok_ref, pos_ref, tfidf_ref, num_ref,
                       emb_ref, pemb_ref,
                       w_tf_ref, b_tf_ref, w_nm_ref, b_nm_ref,
                       w_cat_ref, b_fin_ref,
                       out_ref):
    seq_len = tok_ref.shape[1]
    vpad = emb_ref.shape[0]
    pvpad = pemb_ref.shape[0]

    # --- lyrics branch: in-kernel gather via one-hot counts on the MXU, mean over S
    counts = _one_hot_counts(tok_ref, vpad)            # (TILE_B, Vp)
    lyr = jnp.dot(counts, emb_ref[...],
                  preferred_element_type=jnp.float32) * (1.0 / seq_len)   # (TILE_B, Ep)

    # --- POS branch: sum over P
    pcounts = _one_hot_counts(pos_ref, pvpad)          # (TILE_B, PVp)
    pos = jnp.dot(pcounts, pemb_ref[...],
                  preferred_element_type=jnp.float32)  # (TILE_B, PEp)

    # --- tfidf / numeric branches: relu(x @ W + b), outputs padded to 128 lanes
    tf = jnp.maximum(
        jnp.dot(tfidf_ref[...], w_tf_ref[...],
                preferred_element_type=jnp.float32) + b_tf_ref[...], 0.0)
    nm = jnp.maximum(
        jnp.dot(num_ref[...], w_nm_ref[...],
                preferred_element_type=jnp.float32) + b_nm_ref[...], 0.0)

    # --- fused final matmul: 128-aligned concat, single MXU pass, lane-dense store
    concat = jnp.concatenate([lyr, tf, nm, pos], axis=1)   # (TILE_B, Ep+128+128+PEp)
    out = jnp.dot(concat, w_cat_ref[...],
                  preferred_element_type=jnp.float32) + b_fin_ref[...]
    out_ref[...] = out.astype(out_ref.dtype)


def init_params(key, vocab_size, embedding_dim, hidden_dim, tfidf_input_dim,
                numeric_input_dim, pos_vocab_size, pos_embedding_dim, output_dim):
    ks = jax.random.split(key, 8)
    scale = 0.05
    return {
        "embedding": scale * jax.random.normal(ks[0], (vocab_size, embedding_dim), jnp.float32),
        "pos_embedding": scale * jax.random.normal(ks[1], (pos_vocab_size, pos_embedding_dim), jnp.float32),
        "w_tfidf": scale * jax.random.normal(ks[2], (tfidf_input_dim, 64), jnp.float32),
        "b_tfidf": scale * jax.random.normal(ks[3], (1, 64), jnp.float32),
        "w_num": scale * jax.random.normal(ks[4], (numeric_input_dim, 32), jnp.float32),
        "b_num": scale * jax.random.normal(ks[5], (1, 32), jnp.float32),
        "w_final": scale * jax.random.normal(ks[6], (hidden_dim, output_dim), jnp.float32),
        "b_final": scale * jax.random.normal(ks[7], (1, output_dim), jnp.float32),
    }


def prepare_params(params):
    """One-time zero-padding of every param to lane-dense shapes + pre-packed
    row-partitioned final weight matching the in-kernel concat layout."""
    emb, pemb = params["embedding"], params["pos_embedding"]
    V, E = emb.shape
    PV, PE = pemb.shape
    tf_in = params["w_tfidf"].shape[0]
    nm_in = params["w_num"].shape[0]
    out_dim = params["w_final"].shape[1]

    vpad, e_pad = _round_up(V, _LANE), _round_up(E, _LANE)
    pvpad, pe_pad = _round_up(PV, _LANE), _round_up(PE, _LANE)
    tf_in_pad, nm_in_pad = _round_up(tf_in, _LANE), _round_up(nm_in, _LANE)
    out_pad = _round_up(out_dim, _LANE)

    # concat layout inside kernel: [lyr (e_pad) | tf (128) | nm (128) | pos (pe_pad)]
    off_tf = e_pad
    off_nm = e_pad + _LANE
    off_pos = e_pad + 2 * _LANE
    h_cat = e_pad + 2 * _LANE + pe_pad

    w_final = params["w_final"].astype(jnp.float32)
    w_cat = jnp.zeros((h_cat, out_pad), jnp.float32)
    w_cat = w_cat.at[0:E, :out_dim].set(w_final[0:E])
    w_cat = w_cat.at[off_tf:off_tf + 64, :out_dim].set(w_final[E:E + 64])
    w_cat = w_cat.at[off_nm:off_nm + 32, :out_dim].set(w_final[E + 64:E + 96])
    w_cat = w_cat.at[off_pos:off_pos + PE, :out_dim].set(w_final[E + 96:E + 96 + PE])

    prepped = {
        "emb": _pad_to(emb.astype(jnp.float32), (vpad, e_pad)),
        "pemb": _pad_to(pemb.astype(jnp.float32), (pvpad, pe_pad)),
        "w_tfidf": _pad_to(params["w_tfidf"].astype(jnp.float32), (tf_in_pad, _LANE)),
        "b_tfidf": _pad_to(params["b_tfidf"].astype(jnp.float32), (1, _LANE)),
        "w_num": _pad_to(params["w_num"].astype(jnp.float32), (nm_in_pad, _LANE)),
        "b_num": _pad_to(params["b_num"].astype(jnp.float32), (1, _LANE)),
        "w_cat": w_cat,
        "b_final": _pad_to(params["b_final"].astype(jnp.float32), (1, out_pad)),
    }
    meta = {"tf_in": tf_in, "nm_in": nm_in, "out_dim": out_dim}
    return prepped, meta


def forward_pallas(prepped, meta, numeric_data, tfidf_data, tokenized_lyrics, pos_tags,
                   tile_b=128):
    B = numeric_data.shape[0]
    S = tokenized_lyrics.shape[1]
    P = pos_tags.shape[1]
    tf_in_pad = prepped["w_tfidf"].shape[0]
    nm_in_pad = prepped["w_num"].shape[0]
    out_pad = prepped["w_cat"].shape[1]
    out_dim = meta["out_dim"]

    # Batch tile: sublane-aligned, capped at 128 (small enough for v7x's 64 MiB
    # VMEM with double buffering, big enough to amortize per-step overhead).
    tile_b = min(tile_b, _round_up(B, _SUBLANE))
    b_pad = _round_up(B, tile_b)
    nb = b_pad // tile_b

    tok = _pad_to(tokenized_lyrics.astype(jnp.int32), (b_pad, S))
    pos = _pad_to(pos_tags.astype(jnp.int32), (b_pad, P))
    tfidf = _pad_to(tfidf_data.astype(jnp.float32), (b_pad, tf_in_pad))
    num = _pad_to(numeric_data.astype(jnp.float32), (b_pad, nm_in_pad))

    def batch_spec(cols):
        return pl.BlockSpec((tile_b, cols), lambda i: (i, 0))

    def const_spec(arr):
        return pl.BlockSpec(arr.shape, lambda i: (0, 0))

    inputs = (
        tok, pos, tfidf, num,
        prepped["emb"], prepped["pemb"],
        prepped["w_tfidf"], prepped["b_tfidf"],
        prepped["w_num"], prepped["b_num"],
        prepped["w_cat"], prepped["b_final"],
    )
    in_specs = [
        batch_spec(S),
        batch_spec(P),
        batch_spec(tf_in_pad),
        batch_spec(nm_in_pad),
        const_spec(prepped["emb"]),
        const_spec(prepped["pemb"]),
        const_spec(prepped["w_tfidf"]),
        const_spec(prepped["b_tfidf"]),
        const_spec(prepped["w_num"]),
        const_spec(prepped["b_num"]),
        const_spec(prepped["w_cat"]),
        const_spec(prepped["b_final"]),
    ]
    out_specs = pl.BlockSpec((tile_b, out_pad), lambda i: (i, 0))

    flops = 2 * b_pad * (
        prepped["emb"].shape[0] * prepped["emb"].shape[1]
        + prepped["pemb"].shape[0] * prepped["pemb"].shape[1]
        + tf_in_pad * _LANE + nm_in_pad * _LANE
        + prepped["w_cat"].shape[0] * out_pad
    )
    bytes_accessed = sum(int(x.size) * x.dtype.itemsize for x in inputs) + b_pad * out_pad * 4

    out = pl.pallas_call(
        _classifier_kernel,
        out_shape=jax.ShapeDtypeStruct((b_pad, out_pad), jnp.float32),
        grid=(nb,),
        in_specs=in_specs,
        out_specs=out_specs,
        compiler_params=pltpu.CompilerParams(dimension_semantics=("parallel",)),
        cost_estimate=pl.CostEstimate(flops=flops, transcendentals=0,
                                      bytes_accessed=bytes_accessed),
    )(*inputs)

    return out[:B, :out_dim]


def forward_ref(params, numeric_data, tfidf_data, tokenized_lyrics, pos_tags):
    emb_lyr = jnp.take(params["embedding"], tokenized_lyrics, axis=0)
    emb_pos = jnp.take(params["pos_embedding"], pos_tags, axis=0)
    lyr = jnp.mean(emb_lyr, axis=1)
    pos = jnp.sum(emb_pos, axis=1)
    tf = jax.nn.relu(tfidf_data @ params["w_tfidf"] + params["b_tfidf"])
    nm = jax.nn.relu(numeric_data @ params["w_num"] + params["b_num"])
    concat = jnp.concatenate([lyr, tf, nm, pos], axis=1)
    return concat @ params["w_final"] + params["b_final"]


if __name__ == "__main__":
    # Small shapes consistent with the module's __init__.
    vocab_size, embedding_dim = 100, 32
    pos_vocab_size, pos_embedding_dim = 20, 16
    tfidf_input_dim, numeric_input_dim = 50, 10
    hidden_dim = embedding_dim + 64 + 32 + pos_embedding_dim   # 144
    output_dim = 5
    B, S, P = 2, 8, 6

    key = jax.random.PRNGKey(0)
    k_params, k_tok, k_pos, k_tfidf, k_num = jax.random.split(key, 5)

    params = init_params(k_params, vocab_size, embedding_dim, hidden_dim,
                         tfidf_input_dim, numeric_input_dim,
                         pos_vocab_size, pos_embedding_dim, output_dim)

    tokenized_lyrics = jax.random.randint(k_tok, (B, S), 0, vocab_size, dtype=jnp.int32)
    pos_tags = jax.random.randint(k_pos, (B, P), 0, pos_vocab_size, dtype=jnp.int32)
    tfidf_data = jax.random.normal(k_tfidf, (B, tfidf_input_dim), jnp.float32)
    numeric_data = jax.random.normal(k_num, (B, numeric_input_dim), jnp.float32)

    prepped, meta = prepare_params(params)
    out = forward_pallas(prepped, meta, numeric_data, tfidf_data,
                         tokenized_lyrics, pos_tags)
    out = jax.block_until_ready(out)

    ref = forward_ref(params, numeric_data, tfidf_data, tokenized_lyrics, pos_tags)
    assert out.shape == (B, output_dim), out.shape
    assert jnp.allclose(out, ref, rtol=1e-4, atol=1e-4), (out, ref)
    print("KERNEL_OK")
</pallas_src>

<mosaic_0001>
module attributes {stable_mosaic.version = 11 : i64} {
  func.func @_classifier_kernel(%arg0: i32, %arg1: memref<8x8xi32, #tpu.memory_space<vmem>>, %arg2: memref<8x6xi32, #tpu.memory_space<vmem>>, %arg3: memref<8x128xf32, #tpu.memory_space<vmem>>, %arg4: memref<8x128xf32, #tpu.memory_space<vmem>>, %arg5: memref<128x128xf32, #tpu.memory_space<vmem>>, %arg6: memref<128x128xf32, #tpu.memory_space<vmem>>, %arg7: memref<128x128xf32, #tpu.memory_space<vmem>>, %arg8: memref<1x128xf32, #tpu.memory_space<vmem>>, %arg9: memref<128x128xf32, #tpu.memory_space<vmem>>, %arg10: memref<1x128xf32, #tpu.memory_space<vmem>>, %arg11: memref<512x128xf32, #tpu.memory_space<vmem>>, %arg12: memref<1x128xf32, #tpu.memory_space<vmem>>, %arg13: memref<8x128xf32, #tpu.memory_space<vmem>>) attributes {dimension_semantics = [#tpu.dimension_semantics<parallel>], iteration_bounds = array<i64: 1>, scalar_prefetch = 0 : i64, scratch_operands = 0 : i64, tpu.core_type = #tpu.core_type<tc>, window_params = [{transform_indices = @transform_0, window_bounds = array<i64: 8, 8>}, {transform_indices = @transform_1, window_bounds = array<i64: 8, 6>}, {transform_indices = @transform_2, window_bounds = array<i64: 8, 128>}, {transform_indices = @transform_3, window_bounds = array<i64: 8, 128>}, {pipeline_mode = #tpu.pipeline_mode<synchronous>, transform_indices = @transform_4, window_bounds = array<i64: 128, 128>}, {pipeline_mode = #tpu.pipeline_mode<synchronous>, transform_indices = @transform_5, window_bounds = array<i64: 128, 128>}, {pipeline_mode = #tpu.pipeline_mode<synchronous>, transform_indices = @transform_6, window_bounds = array<i64: 128, 128>}, {pipeline_mode = #tpu.pipeline_mode<synchronous>, transform_indices = @transform_7, window_bounds = array<i64: 1, 128>}, {pipeline_mode = #tpu.pipeline_mode<synchronous>, transform_indices = @transform_8, window_bounds = array<i64: 128, 128>}, {pipeline_mode = #tpu.pipeline_mode<synchronous>, transform_indices = @transform_9, window_bounds = array<i64: 1, 128>}, {pipeline_mode = #tpu.pipeline_mode<synchronous>, transform_indices = @transform_10, window_bounds = array<i64: 512, 128>}, {pipeline_mode = #tpu.pipeline_mode<synchronous>, transform_indices = @transform_11, window_bounds = array<i64: 1, 128>}, {transform_indices = @transform_12, window_bounds = array<i64: 8, 128>}]} {
    %0 = tpu.iota {dimensions = array<i32: 1>} : vector<8x128xi32>
    %cst = arith.constant 0.000000e+00 : f32
    %1 = vector.broadcast %cst : f32 to vector<8x128xf32>
    %c0 = arith.constant 0 : index
    %c0_0 = arith.constant 0 : index
    %2 = vector.load %arg1[%c0, %c0_0] : memref<8x8xi32, #tpu.memory_space<vmem>>, vector<8x1xi32>
    %3 = vector.broadcast %2 : vector<8x1xi32> to vector<8x128xi32>
    %4 = arith.cmpi eq, %3, %0 : vector<8x128xi32>
    %5 = arith.extui %4 : vector<8x128xi1> to vector<8x128xi32>
    %6 = arith.sitofp %5 : vector<8x128xi32> to vector<8x128xf32>
    %7 = arith.addf %1, %6 : vector<8x128xf32>
    %c0_1 = arith.constant 0 : index
    %c1 = arith.constant 1 : index
    %8 = vector.load %arg1[%c0_1, %c1] : memref<8x8xi32, #tpu.memory_space<vmem>>, vector<8x1xi32>
    %9 = vector.broadcast %8 : vector<8x1xi32> to vector<8x128xi32>
    %10 = arith.cmpi eq, %9, %0 : vector<8x128xi32>
    %11 = arith.extui %10 : vector<8x128xi1> to vector<8x128xi32>
    %12 = arith.sitofp %11 : vector<8x128xi32> to vector<8x128xf32>
    %13 = arith.addf %7, %12 : vector<8x128xf32>
    %c0_2 = arith.constant 0 : index
    %c2 = arith.constant 2 : index
    %14 = vector.load %arg1[%c0_2, %c2] : memref<8x8xi32, #tpu.memory_space<vmem>>, vector<8x1xi32>
    %15 = vector.broadcast %14 : vector<8x1xi32> to vector<8x128xi32>
    %16 = arith.cmpi eq, %15, %0 : vector<8x128xi32>
    %17 = arith.extui %16 : vector<8x128xi1> to vector<8x128xi32>
    %18 = arith.sitofp %17 : vector<8x128xi32> to vector<8x128xf32>
    %19 = arith.addf %13, %18 : vector<8x128xf32>
    %c0_3 = arith.constant 0 : index
    %c3 = arith.constant 3 : index
    %20 = vector.load %arg1[%c0_3, %c3] : memref<8x8xi32, #tpu.memory_space<vmem>>, vector<8x1xi32>
    %21 = vector.broadcast %20 : vector<8x1xi32> to vector<8x128xi32>
    %22 = arith.cmpi eq, %21, %0 : vector<8x128xi32>
    %23 = arith.extui %22 : vector<8x128xi1> to vector<8x128xi32>
    %24 = arith.sitofp %23 : vector<8x128xi32> to vector<8x128xf32>
    %25 = arith.addf %19, %24 : vector<8x128xf32>
    %c0_4 = arith.constant 0 : index
    %c4 = arith.constant 4 : index
    %26 = vector.load %arg1[%c0_4, %c4] : memref<8x8xi32, #tpu.memory_space<vmem>>, vector<8x1xi32>
    %27 = vector.broadcast %26 : vector<8x1xi32> to vector<8x128xi32>
    %28 = arith.cmpi eq, %27, %0 : vector<8x128xi32>
    %29 = arith.extui %28 : vector<8x128xi1> to vector<8x128xi32>
    %30 = arith.sitofp %29 : vector<8x128xi32> to vector<8x128xf32>
    %31 = arith.addf %25, %30 : vector<8x128xf32>
    %c0_5 = arith.constant 0 : index
    %c5 = arith.constant 5 : index
    %32 = vector.load %arg1[%c0_5, %c5] : memref<8x8xi32, #tpu.memory_space<vmem>>, vector<8x1xi32>
    %33 = vector.broadcast %32 : vector<8x1xi32> to vector<8x128xi32>
    %34 = arith.cmpi eq, %33, %0 : vector<8x128xi32>
    %35 = arith.extui %34 : vector<8x128xi1> to vector<8x128xi32>
    %36 = arith.sitofp %35 : vector<8x128xi32> to vector<8x128xf32>
    %37 = arith.addf %31, %36 : vector<8x128xf32>
    %c0_6 = arith.constant 0 : index
    %c6 = arith.constant 6 : index
    %38 = vector.load %arg1[%c0_6, %c6] : memref<8x8xi32, #tpu.memory_space<vmem>>, vector<8x1xi32>
    %39 = vector.broadcast %38 : vector<8x1xi32> to vector<8x128xi32>
    %40 = arith.cmpi eq, %39, %0 : vector<8x128xi32>
    %41 = arith.extui %40 : vector<8x128xi1> to vector<8x128xi32>
    %42 = arith.sitofp %41 : vector<8x128xi32> to vector<8x128xf32>
    %43 = arith.addf %37, %42 : vector<8x128xf32>
    %c0_7 = arith.constant 0 : index
    %c7 = arith.constant 7 : index
    %44 = vector.load %arg1[%c0_7, %c7] : memref<8x8xi32, #tpu.memory_space<vmem>>, vector<8x1xi32>
    %45 = vector.broadcast %44 : vector<8x1xi32> to vector<8x128xi32>
    %46 = arith.cmpi eq, %45, %0 : vector<8x128xi32>
    %47 = arith.extui %46 : vector<8x128xi1> to vector<8x128xi32>
    %48 = arith.sitofp %47 : vector<8x128xi32> to vector<8x128xf32>
    %49 = arith.addf %43, %48 : vector<8x128xf32>
    %c0_8 = arith.constant 0 : index
    %c0_9 = arith.constant 0 : index
    %50 = vector.load %arg5[%c0_8, %c0_9] : memref<128x128xf32, #tpu.memory_space<vmem>>, vector<128x128xf32>
    %cst_10 = arith.constant dense<0.000000e+00> : vector<8x128xf32>
    %51 = tpu.matmul %49, %50, %cst_10 {dimension_numbers = #tpu.dot_dimension_numbers<[1], [0], [0], [1], [0, 0, 1, 1], [], []>} : vector<8x128xf32>, vector<128x128xf32>, vector<8x128xf32> -> vector<8x128xf32>
    %cst_11 = arith.constant 1.250000e-01 : f32
    %52 = vector.broadcast %cst_11 : f32 to vector<8x128xf32>
    %53 = arith.mulf %51, %52 : vector<8x128xf32>
    %54 = tpu.iota {dimensions = array<i32: 1>} : vector<8x128xi32>
    %cst_12 = arith.constant 0.000000e+00 : f32
    %55 = vector.broadcast %cst_12 : f32 to vector<8x128xf32>
    %c0_13 = arith.constant 0 : index
    %c0_14 = arith.constant 0 : index
    %56 = vector.load %arg2[%c0_13, %c0_14] : memref<8x6xi32, #tpu.memory_space<vmem>>, vector<8x1xi32>
    %57 = vector.broadcast %56 : vector<8x1xi32> to vector<8x128xi32>
    %58 = arith.cmpi eq, %57, %54 : vector<8x128xi32>
    %59 = arith.extui %58 : vector<8x128xi1> to vector<8x128xi32>
    %60 = arith.sitofp %59 : vector<8x128xi32> to vector<8x128xf32>
    %61 = arith.addf %55, %60 : vector<8x128xf32>
    %c0_15 = arith.constant 0 : index
    %c1_16 = arith.constant 1 : index
    %62 = vector.load %arg2[%c0_15, %c1_16] : memref<8x6xi32, #tpu.memory_space<vmem>>, vector<8x1xi32>
    %63 = vector.broadcast %62 : vector<8x1xi32> to vector<8x128xi32>
    %64 = arith.cmpi eq, %63, %54 : vector<8x128xi32>
    %65 = arith.extui %64 : vector<8x128xi1> to vector<8x128xi32>
    %66 = arith.sitofp %65 : vector<8x128xi32> to vector<8x128xf32>
    %67 = arith.addf %61, %66 : vector<8x128xf32>
    %c0_17 = arith.constant 0 : index
    %c2_18 = arith.constant 2 : index
    %68 = vector.load %arg2[%c0_17, %c2_18] : memref<8x6xi32, #tpu.memory_space<vmem>>, vector<8x1xi32>
    %69 = vector.broadcast %68 : vector<8x1xi32> to vector<8x128xi32>
    %70 = arith.cmpi eq, %69, %54 : vector<8x128xi32>
    %71 = arith.extui %70 : vector<8x128xi1> to vector<8x128xi32>
    %72 = arith.sitofp %71 : vector<8x128xi32> to vector<8x128xf32>
    %73 = arith.addf %67, %72 : vector<8x128xf32>
    %c0_19 = arith.constant 0 : index
    %c3_20 = arith.constant 3 : index
    %74 = vector.load %arg2[%c0_19, %c3_20] : memref<8x6xi32, #tpu.memory_space<vmem>>, vector<8x1xi32>
    %75 = vector.broadcast %74 : vector<8x1xi32> to vector<8x128xi32>
    %76 = arith.cmpi eq, %75, %54 : vector<8x128xi32>
    %77 = arith.extui %76 : vector<8x128xi1> to vector<8x128xi32>
    %78 = arith.sitofp %77 : vector<8x128xi32> to vector<8x128xf32>
    %79 = arith.addf %73, %78 : vector<8x128xf32>
    %c0_21 = arith.constant 0 : index
    %c4_22 = arith.constant 4 : index
    %80 = vector.load %arg2[%c0_21, %c4_22] : memref<8x6xi32, #tpu.memory_space<vmem>>, vector<8x1xi32>
    %81 = vector.broadcast %80 : vector<8x1xi32> to vector<8x128xi32>
    %82 = arith.cmpi eq, %81, %54 : vector<8x128xi32>
    %83 = arith.extui %82 : vector<8x128xi1> to vector<8x128xi32>
    %84 = arith.sitofp %83 : vector<8x128xi32> to vector<8x128xf32>
    %85 = arith.addf %79, %84 : vector<8x128xf32>
    %c0_23 = arith.constant 0 : index
    %c5_24 = arith.constant 5 : index
    %86 = vector.load %arg2[%c0_23, %c5_24] : memref<8x6xi32, #tpu.memory_space<vmem>>, vector<8x1xi32>
    %87 = vector.broadcast %86 : vector<8x1xi32> to vector<8x128xi32>
    %88 = arith.cmpi eq, %87, %54 : vector<8x128xi32>
    %89 = arith.extui %88 : vector<8x128xi1> to vector<8x128xi32>
    %90 = arith.sitofp %89 : vector<8x128xi32> to vector<8x128xf32>
    %91 = arith.addf %85, %90 : vector<8x128xf32>
    %c0_25 = arith.constant 0 : index
    %c0_26 = arith.constant 0 : index
    %92 = vector.load %arg6[%c0_25, %c0_26] : memref<128x128xf32, #tpu.memory_space<vmem>>, vector<128x128xf32>
    %cst_27 = arith.constant dense<0.000000e+00> : vector<8x128xf32>
    %93 = tpu.matmul %91, %92, %cst_27 {dimension_numbers = #tpu.dot_dimension_numbers<[1], [0], [0], [1], [0, 0, 1, 1], [], []>} : vector<8x128xf32>, vector<128x128xf32>, vector<8x128xf32> -> vector<8x128xf32>
    %c0_28 = arith.constant 0 : index
    %c0_29 = arith.constant 0 : index
    %94 = vector.load %arg3[%c0_28, %c0_29] : memref<8x128xf32, #tpu.memory_space<vmem>>, vector<8x128xf32>
    %c0_30 = arith.constant 0 : index
    %c0_31 = arith.constant 0 : index
    %95 = vector.load %arg7[%c0_30, %c0_31] : memref<128x128xf32, #tpu.memory_space<vmem>>, vector<128x128xf32>
    %cst_32 = arith.constant dense<0.000000e+00> : vector<8x128xf32>
    %96 = tpu.matmul %94, %95, %cst_32 {dimension_numbers = #tpu.dot_dimension_numbers<[1], [0], [0], [1], [0, 0, 1, 1], [], []>} : vector<8x128xf32>, vector<128x128xf32>, vector<8x128xf32> -> vector<8x128xf32>
    %c0_33 = arith.constant 0 : index
    %c0_34 = arith.constant 0 : index
    %97 = vector.load %arg8[%c0_33, %c0_34] : memref<1x128xf32, #tpu.memory_space<vmem>>, vector<1x128xf32>
    %98 = vector.broadcast %97 : vector<1x128xf32> to vector<8x128xf32>
    %99 = arith.addf %96, %98 : vector<8x128xf32>
    %cst_35 = arith.constant 0.000000e+00 : f32
    %100 = vector.broadcast %cst_35 : f32 to vector<8x128xf32>
    %101 = arith.maximumf %99, %100 : vector<8x128xf32>
    %c0_36 = arith.constant 0 : index
    %c0_37 = arith.constant 0 : index
    %102 = vector.load %arg4[%c0_36, %c0_37] : memref<8x128xf32, #tpu.memory_space<vmem>>, vector<8x128xf32>
    %c0_38 = arith.constant 0 : index
    %c0_39 = arith.constant 0 : index
    %103 = vector.load %arg9[%c0_38, %c0_39] : memref<128x128xf32, #tpu.memory_space<vmem>>, vector<128x128xf32>
    %cst_40 = arith.constant dense<0.000000e+00> : vector<8x128xf32>
    %104 = tpu.matmul %102, %103, %cst_40 {dimension_numbers = #tpu.dot_dimension_numbers<[1], [0], [0], [1], [0, 0, 1, 1], [], []>} : vector<8x128xf32>, vector<128x128xf32>, vector<8x128xf32> -> vector<8x128xf32>
    %c0_41 = arith.constant 0 : index
    %c0_42 = arith.constant 0 : index
    %105 = vector.load %arg10[%c0_41, %c0_42] : memref<1x128xf32, #tpu.memory_space<vmem>>, vector<1x128xf32>
    %106 = vector.broadcast %105 : vector<1x128xf32> to vector<8x128xf32>
    %107 = arith.addf %104, %106 : vector<8x128xf32>
    %cst_43 = arith.constant 0.000000e+00 : f32
    %108 = vector.broadcast %cst_43 : f32 to vector<8x128xf32>
    %109 = arith.maximumf %107, %108 : vector<8x128xf32>
    %110 = tpu.concatenate %53, %101, %109, %93 in 1 : vector<8x128xf32>, vector<8x128xf32>, vector<8x128xf32>, vector<8x128xf32> -> vector<8x512xf32>
    %c0_44 = arith.constant 0 : index
    %c0_45 = arith.constant 0 : index
    %111 = vector.load %arg11[%c0_44, %c0_45] : memref<512x128xf32, #tpu.memory_space<vmem>>, vector<512x128xf32>
    %cst_46 = arith.constant dense<0.000000e+00> : vector<8x128xf32>
    %112 = tpu.matmul %110, %111, %cst_46 {dimension_numbers = #tpu.dot_dimension_numbers<[1], [0], [0], [1], [0, 0, 1, 1], [], []>} : vector<8x512xf32>, vector<512x128xf32>, vector<8x128xf32> -> vector<8x128xf32>
    %c0_47 = arith.constant 0 : index
    %c0_48 = arith.constant 0 : index
    %113 = vector.load %arg12[%c0_47, %c0_48] : memref<1x128xf32, #tpu.memory_space<vmem>>, vector<1x128xf32>
    %114 = vector.broadcast %113 : vector<1x128xf32> to vector<8x128xf32>
    %115 = arith.addf %112, %114 : vector<8x128xf32>
    %c0_49 = arith.constant 0 : index
    %c0_50 = arith.constant 0 : index
    %116 = vector.load %arg13[%c0_49, %c0_50] : memref<8x128xf32, #tpu.memory_space<vmem>>, vector<8x128xf32>
    tpu.vector_store %arg13[%c0_49, %c0_50], %115 {strides = array<i32>} : memref<8x128xf32, #tpu.memory_space<vmem>>, vector<8x128xf32>,
    return
  }
  func.func @transform_0(%arg0: i32) -> (i32, i32) {
    %c0_i32 = arith.constant 0 : i32
    %c0_i32_0 = arith.constant 0 : i32
    return %arg0, %c0_i32 : i32, i32
  }
  func.func @transform_1(%arg0: i32) -> (i32, i32) {
    %c0_i32 = arith.constant 0 : i32
    %c0_i32_0 = arith.constant 0 : i32
    return %arg0, %c0_i32 : i32, i32
  }
  func.func @transform_2(%arg0: i32) -> (i32, i32) {
    %c0_i32 = arith.constant 0 : i32
    %c0_i32_0 = arith.constant 0 : i32
    return %arg0, %c0_i32 : i32, i32
  }
  func.func @transform_3(%arg0: i32) -> (i32, i32) {
    %c0_i32 = arith.constant 0 : i32
    %c0_i32_0 = arith.constant 0 : i32
    return %arg0, %c0_i32 : i32, i32
  }
  func.func @transform_4(%arg0: i32) -> (i32, i32) {
    %c0_i32 = arith.constant 0 : i32
    %c0_i32_0 = arith.constant 0 : i32
    %c0_i32_1 = arith.constant 0 : i32
    return %c0_i32, %c0_i32_0 : i32, i32
  }
  func.func @transform_5(%arg0: i32) -> (i32, i32) {
    %c0_i32 = arith.constant 0 : i32
    %c0_i32_0 = arith.constant 0 : i32
    %c0_i32_1 = arith.constant 0 : i32
    return %c0_i32, %c0_i32_0 : i32, i32
  }
  func.func @transform_6(%arg0: i32) -> (i32, i32) {
    %c0_i32 = arith.constant 0 : i32
    %c0_i32_0 = arith.constant 0 : i32
    %c0_i32_1 = arith.constant 0 : i32
    return %c0_i32, %c0_i32_0 : i32, i32
  }
  func.func @transform_7(%arg0: i32) -> (i32, i32) {
    %c0_i32 = arith.constant 0 : i32
    %c0_i32_0 = arith.constant 0 : i32
    %c0_i32_1 = arith.constant 0 : i32
    return %c0_i32, %c0_i32_0 : i32, i32
  }
  func.func @transform_8(%arg0: i32) -> (i32, i32) {
    %c0_i32 = arith.constant 0 : i32
    %c0_i32_0 = arith.constant 0 : i32
    %c0_i32_1 = arith.constant 0 : i32
    return %c0_i32, %c0_i32_0 : i32, i32
  }
  func.func @transform_9(%arg0: i32) -> (i32, i32) {
    %c0_i32 = arith.constant 0 : i32
    %c0_i32_0 = arith.constant 0 : i32
    %c0_i32_1 = arith.constant 0 : i32
    return %c0_i32, %c0_i32_0 : i32, i32
  }
  func.func @transform_10(%arg0: i32) -> (i32, i32) {
    %c0_i32 = arith.constant 0 : i32
    %c0_i32_0 = arith.constant 0 : i32
    %c0_i32_1 = arith.constant 0 : i32
    return %c0_i32, %c0_i32_0 : i32, i32
  }
  func.func @transform_11(%arg0: i32) -> (i32, i32) {
    %c0_i32 = arith.constant 0 : i32
    %c0_i32_0 = arith.constant 0 : i32
    %c0_i32_1 = arith.constant 0 : i32
    return %c0_i32, %c0_i32_0 : i32, i32
  }
  func.func @transform_12(%arg0: i32) -> (i32, i32) {
    %c0_i32 = arith.constant 0 : i32
    %c0_i32_0 = arith.constant 0 : i32
    return %arg0, %c0_i32 : i32, i32
  }
}

</mosaic_0001>

<bundles_post_ra>
// kernel: tpu_custom_call.1
= control target key start
LH: loop header
LB: loop body
LE: loop exit
PB: predicated region body
PF: predicated region fallthrough
CT: control target
= control target key end

     0   :  { %17 = vsyncpa [#allocation3], 0  ;;  %s1878_s0 = inlined_call_operand.hbm [shape: s32[8,8], index: 0, kind: input, shape index: {}]   ;;  %s1879_s1 = inlined_call_operand.hbm [shape: s32[8,6], index: 1, kind: input, shape index: {}]   ;;  %s1880_s2 = inlined_call_operand.hbm [shape: f32[8,128], index: 2, kind: input, shape index: {}]   ;;  %s1881_s3 = inlined_call_operand.vmem [shape: f32[8,128], index: 3, kind: input, shape index: {}]   ;;  %s1882_s4 = inlined_call_operand.hbm [shape: f32[128,128], index: 4, kind: input, shape index: {}]   ;;  %s1883_s5 = inlined_call_operand.hbm [shape: f32[128,128], index: 5, kind: input, shape index: {}]   ;;  %s1884_s6 = inlined_call_operand.hbm [shape: f32[128,128], index: 6, kind: input, shape index: {}]   ;;  %s1885_s7 = inlined_call_operand.vmem [shape: f32[1,128], index: 7, kind: input, shape index: {}]   ;;  %s1886_s8 = inlined_call_operand.hbm [shape: f32[128,128], index: 8, kind: input, shape index: {}]   ;;  %s1887_s9 = inlined_call_operand.vmem [shape: f32[1,128], index: 9, kind: input, shape index: {}]   ;;  %s1888_s10 = inlined_call_operand.hbm [shape: f32[512,128], index: 10, kind: input, shape index: {}]   ;;  %s1889_s11 = inlined_call_operand.vmem [shape: f32[1,128], index: 11, kind: input, shape index: {}]   ;;  %s1890_s12 = inlined_call_operand.hbm [shape: f32[8,128], index: 12, kind: output, shape index: {}]  }
   0x1   :  { %18 = vsyncpa [#allocation6], 0 }
   0x2   :  { %19 = vsyncpa [#allocation9], 0 }
   0x3   :  { %20 = vsyncpa [#allocation12], 0 }
   0x4   :  { %21 = vsyncpa [#allocation15], 0 }
   0x5   :  { %22 = vsyncpa [#allocation4], 0  ;;  %s1543_s21 = smov [#allocation5]   ;;  %s1544_s23 = smov [#allocation8]  }
   0x6   :  { %s39_s22 = sshll.u32 %s1543_s21, 4  ;;  %s60_s24 = sshll.u32 %s1544_s23, 4  ;;  %s40_s22 = int_to_ptr.vmem [resolvable:$true] %s39_s22  ;;  %s1630_s24 = int_to_ptr.vmem [resolvable:$true] %s60_s24 }
   0x7   :  { %s1333_s27 = scalar_lea.hbm %s1879_s1, 128 }
   0x8   :  { %p1334_p0 = scmp.ne.s32.totalorder %s1879_s1, %s1333_s27  ;;  %p1337_p1 = scmp.lt.u32.totalorder %s1333_s27, %s1879_s1 }
   0xa   :  { %p1339_p2 = pnand %p1337_p1, %p1334_p0 }
   0xc   :  { %1342 = shalt.err (!%p1339_p2)
}
   0xd   :  { %s1343_s14 = scalar_lea.vmem %s40_s22, 128  ;;  %p1348_p4 = scmp.lt.s32.totalorder %s40_s22, %s40_s22 }
   0xe   :  { %p1344_p3 = scmp.ne.s32.totalorder %s40_s22, %s1343_s14  ;;  %p1349_p5 = scmp.lt.s32.totalorder %s1343_s14, %s1343_s14 }
  0x10   :  { %p1350_p6 = por %p1349_p5, %p1348_p4 }
  0x12   :  { %p1351_p7 = pnand %p1350_p6, %p1344_p3 }
  0x14   :  { %1354 = shalt.err (!%p1351_p7)
}
  0x15   :  { %42 = dma.hbm_to_vmem [thread:$0]  %s1879_s1, 128, %s40_s22, [#allocation6]  }
  0x16   :  { %s1355_s19 = scalar_lea.hbm %s1882_s4, 2048 }
  0x17   :  { %p1356_p8 = scmp.ne.s32.totalorder %s1882_s4, %s1355_s19  ;;  %p1359_p9 = scmp.lt.u32.totalorder %s1355_s19, %s1882_s4 }
  0x19   :  { %p1361_p10 = pnand %p1359_p9, %p1356_p8 }
  0x1b   :  { %1364 = shalt.err (!%p1361_p10)
}
  0x1c   :  { %s1365_s26 = scalar_lea.vmem %s1630_s24, 2048  ;;  %p1370_p12 = scmp.lt.s32.totalorder %s1630_s24, %s1630_s24 }
  0x1d   :  { %p1366_p11 = scmp.ne.s32.totalorder %s1630_s24, %s1365_s26  ;;  %p1371_p13 = scmp.lt.s32.totalorder %s1365_s26, %s1365_s26 }
  0x1f   :  { %p1372_p0 = por %p1371_p13, %p1370_p12 }
  0x21   :  { %p1373_p1 = pnand %p1372_p0, %p1366_p11 }
  0x23   :  { %1376 = shalt.err (!%p1373_p1)
}
  0x24   :  { %s1545_s1 = smov 128   ;;  %s1546_s22 = smov 8  }
  0x25   :  { %66 = dma.hbm_to_vmem [thread:$0]  %s1882_s4, 2048, %s1630_s24, [#allocation9], %s1545_s1, %s1545_s1, %s1546_s22  }
  0x26   :  { %s1547_s29 = smov [#allocation11]   ;;  %s1548_s13 = smov [#allocation2]  }
  0x27   :  { %s84_s30 = sshll.u32 %s1547_s29, 4  ;;  %s29_s14 = sshll.u32 %s1548_s13, 4  ;;  %s85_s30 = int_to_ptr.vmem [resolvable:$true] %s84_s30  ;;  %s30_s14 = int_to_ptr.vmem [resolvable:$true] %s29_s14 }
  0x28   :  { %s1377_s17 = scalar_lea.hbm %s1884_s6, 2048 }
  0x29   :  { %p1378_p2 = scmp.ne.s32.totalorder %s1884_s6, %s1377_s17  ;;  %p1381_p3 = scmp.lt.u32.totalorder %s1377_s17, %s1884_s6 }
  0x2b   :  { %p1383_p4 = pnand %p1381_p3, %p1378_p2 }
  0x2d   :  { %1386 = shalt.err (!%p1383_p4)
}
  0x2e   :  { %s1387_s4 = scalar_lea.vmem %s85_s30, 2048  ;;  %p1392_p6 = scmp.lt.s32.totalorder %s85_s30, %s85_s30 }
  0x2f   :  { %p1388_p5 = scmp.ne.s32.totalorder %s85_s30, %s1387_s4  ;;  %p1393_p7 = scmp.lt.s32.totalorder %s1387_s4, %s1387_s4 }
  0x31   :  { %p1394_p8 = por %p1393_p7, %p1392_p6 }
  0x33   :  { %p1395_p9 = pnand %p1394_p8, %p1388_p5 }
  0x35   :  { %1398 = shalt.err (!%p1395_p9)
}
  0x36   :  { %90 = dma.hbm_to_vmem [thread:$0]  %s1884_s6, 2048, %s85_s30, [#allocation12], %s1545_s1, %s1545_s1, %s1546_s22  }
  0x37   :  { %s1399_s27 = scalar_lea.hbm %s1878_s0, 128 }
  0x38   :  { %p1400_p10 = scmp.ne.s32.totalorder %s1878_s0, %s1399_s27  ;;  %p1403_p11 = scmp.lt.u32.totalorder %s1399_s27, %s1878_s0 }
  0x3a   :  { %p1405_p12 = pnand %p1403_p11, %p1400_p10 }
  0x3c   :  { %1408 = shalt.err (!%p1405_p12)
}
  0x3d   :  { %s1409_s16 = scalar_lea.vmem %s30_s14, 128  ;;  %p1414_p0 = scmp.lt.s32.totalorder %s30_s14, %s30_s14 }
  0x3e   :  { %p1410_p13 = scmp.ne.s32.totalorder %s30_s14, %s1409_s16  ;;  %p1415_p1 = scmp.lt.s32.totalorder %s1409_s16, %s1409_s16 }
  0x40   :  { %p1416_p2 = por %p1415_p1, %p1414_p0 }
  0x42   :  { %p1417_p3 = pnand %p1416_p2, %p1410_p13 }
  0x44   :  { %1420 = shalt.err (!%p1417_p3)
}
  0x45   :  { %32 = dma.hbm_to_vmem [thread:$0]  %s1878_s0, 128, %s30_s14, [#allocation3]  }
  0x46   :  { %s1549_s17 = smov [#allocation7]   ;;  %s1550_s19 = smov [#allocation10]  }
  0x47   :  { %s49_s18 = sshll.u32 %s1549_s17, 4  ;;  %s72_s20 = sshll.u32 %s1550_s19, 4  ;;  %s50_s18 = int_to_ptr.vmem [resolvable:$true] %s49_s18  ;;  %s1691_s20 = int_to_ptr.vmem [resolvable:$true] %s72_s20 }
  0x48   :  { %s1421_s24 = scalar_lea.hbm %s1880_s2, 128 }
  0x49   :  { %p1422_p4 = scmp.ne.s32.totalorder %s1880_s2, %s1421_s24  ;;  %p1425_p5 = scmp.lt.u32.totalorder %s1421_s24, %s1880_s2 }
  0x4b   :  { %p1427_p6 = pnand %p1425_p5, %p1422_p4 }
  0x4d   :  { %1430 = shalt.err (!%p1427_p6)
}
  0x4e   :  { %s1431_s0 = scalar_lea.vmem %s50_s18, 128  ;;  %p1436_p8 = scmp.lt.s32.totalorder %s50_s18, %s50_s18 }
  0x4f   :  { %p1432_p7 = scmp.ne.s32.totalorder %s50_s18, %s1431_s0  ;;  %p1437_p9 = scmp.lt.s32.totalorder %s1431_s0, %s1431_s0 }
  0x51   :  { %p1438_p10 = por %p1437_p9, %p1436_p8 }
  0x53   :  { %p1439_p11 = pnand %p1438_p10, %p1432_p7 }
  0x55   :  { %1442 = shalt.err (!%p1439_p11)
}
  0x56   :  { %52 = dma.hbm_to_vmem [thread:$0]  %s1880_s2, 128, %s50_s18, [#allocation6]  }
  0x57   :  { %s1443_s15 = scalar_lea.hbm %s1883_s5, 2048 }
  0x58   :  { %p1444_p12 = scmp.ne.s32.totalorder %s1883_s5, %s1443_s15  ;;  %p1447_p13 = scmp.lt.u32.totalorder %s1443_s15, %s1883_s5 }
  0x5a   :  { %p1449_p0 = pnand %p1447_p13, %p1444_p12 }
  0x5c   :  { %1452 = shalt.err (!%p1449_p0)
}
  0x5d   :  { %s1453_s19 = scalar_lea.vmem %s1691_s20, 2048  ;;  %p1458_p2 = scmp.lt.s32.totalorder %s1691_s20, %s1691_s20 }
  0x5e   :  { %p1454_p1 = scmp.ne.s32.totalorder %s1691_s20, %s1453_s19  ;;  %p1459_p3 = scmp.lt.s32.totalorder %s1453_s19, %s1453_s19 }
  0x60   :  { %p1460_p4 = por %p1459_p3, %p1458_p2 }
  0x62   :  { %p1461_p5 = pnand %p1460_p4, %p1454_p1 }
  0x64   :  { %1464 = shalt.err (!%p1461_p5)
}
  0x65   :  { %78 = dma.hbm_to_vmem [thread:$0]  %s1883_s5, 2048, %s1691_s20, [#allocation9], %s1545_s1, %s1545_s1, %s1546_s22  }
  0x66   :  { %s1551_s21 = smov [#allocation13]   ;;  %s1552_s24 = smov [#allocation14]  }
  0x67   :  { %s98_s4 = sshll.u32 %s1551_s21, 4  ;;  %s112_s23 = sshll.u32 %s1552_s24, 4  ;;  %s99_s4 = int_to_ptr.vmem [resolvable:$true] %s98_s4  ;;  %s1725_s23 = int_to_ptr.vmem [resolvable:$true] %s112_s23 }
  0x68   :  { %s1465_s27 = scalar_lea.hbm %s1886_s8, 2048 }
  0x69   :  { %p1466_p6 = scmp.ne.s32.totalorder %s1886_s8, %s1465_s27  ;;  %p1469_p7 = scmp.lt.u32.totalorder %s1465_s27, %s1886_s8 }
  0x6b   :  { %p1471_p8 = pnand %p1469_p7, %p1466_p6 }
  0x6d   :  { %1474 = shalt.err (!%p1471_p8)
}
  0x6e   :  { %s1475_s5 = scalar_lea.vmem %s99_s4, 2048  ;;  %p1480_p10 = scmp.lt.s32.totalorder %s99_s4, %s99_s4 }
  0x6f   :  { %p1476_p9 = scmp.ne.s32.totalorder %s99_s4, %s1475_s5  ;;  %p1481_p11 = scmp.lt.s32.totalorder %s1475_s5, %s1475_s5 }
  0x71   :  { %p1482_p12 = por %p1481_p11, %p1480_p10 }
  0x73   :  { %p1483_p13 = pnand %p1482_p12, %p1476_p9 }
  0x75   :  { %1486 = shalt.err (!%p1483_p13)
}
  0x76   :  { %104 = dma.hbm_to_vmem [thread:$0]  %s1886_s8, 2048, %s99_s4, [#allocation12], %s1545_s1, %s1545_s1, %s1546_s22  }
  0x77   :  { %s1487_s6 = scalar_lea.hbm %s1888_s10, 8192 }
  0x78   :  { %p1488_p0 = scmp.ne.s32.totalorder %s1888_s10, %s1487_s6  ;;  %p1491_p1 = scmp.lt.u32.totalorder %s1487_s6, %s1888_s10 }
  0x7a   :  { %p1493_p2 = pnand %p1491_p1, %p1488_p0 }
  0x7c   :  { %1496 = shalt.err (!%p1493_p2)
}
  0x7d   :  { %s1497_s18 = scalar_lea.vmem %s1725_s23, 8192  ;;  %p1502_p4 = scmp.lt.s32.totalorder %s1725_s23, %s1725_s23 }
  0x7e   :  { %p1498_p3 = scmp.ne.s32.totalorder %s1725_s23, %s1497_s18  ;;  %p1503_p5 = scmp.lt.s32.totalorder %s1497_s18, %s1497_s18 }
  0x80   :  { %p1504_p6 = por %p1503_p5, %p1502_p4 }
  0x82   :  { %p1505_p7 = pnand %p1504_p6, %p1498_p3 }
  0x84   :  { %1508 = shalt.err (!%p1505_p7)
}
  0x85   :  { %118 = dma.hbm_to_vmem [thread:$0]  %s1888_s10, 8192, %s1725_s23, [#allocation15], %s1545_s1, %s1545_s1, %s1546_s22  }
  0x86   :  { %1531 = dma.done.wait [#allocation3], 128  }
  0x87   :  { %1532 = vsyncadd [#allocation3], 4294967168 }
  0x88   :  { %1533 = dma.done.wait [#allocation6], 256  }
  0x89   :  { %1534 = vsyncadd [#allocation6], 4294967040 }
  0x8a   :  { %1535 = dma.done.wait [#allocation9], 4096  }
  0x8b   :  { %1536 = vsyncadd [#allocation9], 4294963200 }
  0x8c   :  { %1537 = dma.done.wait [#allocation12], 4096  }
  0x8d   :  { %1538 = vsyncadd [#allocation12], 4294963200 }
  0x8e   :  { %1539 = dma.done.wait [#allocation15], 8192  }
  0x8f   :  { %1540 = vsyncadd [#allocation15], 4294959104  ;;  %v1553_v0 = vmov 2   ;;  %v1554_v1 = vmov 0   ;;  %v1555_v2 = vmov 0.0|0.0   ;;  %v1764_v3 = vld [vmem:[#allocation2] sm:$0xff]  ;;  %v145_v60 = vlaneseq }
  0x90   :  { %1320 = vset.pattern.permute.xlu1 %v1553_v0  ;;  %1318 = vset.pattern.permute.xlu0 %v1554_v1  ;;  %v204_v4 = vld [vmem:[#allocation8] sm:$0xff]  ;;  %v205_v5 = vld [vmem:[#allocation8 + $0x8] sm:$0xff]  ;;  %v206_v6 = vld [vmem:[#allocation8 + $0x10] sm:$0xff]  ;;  %v1556_v10 = vmov 3   ;;  %v1557_v11 = vmov 1   ;;  %v1558_v17 = vmov 4  }
  0x91   :  { %1136 = vmatprep.subr.bf16.mxu0 %v1555_v2  ;;  %1160 = vmatprep.subr.bf16.mxu1 %v1555_v2  ;;  %v207_v7 = vld [vmem:[#allocation8 + $0x18] sm:$0xff]  ;;  %v1137_v8 = vpack.c.bf16 %v205_v5, %v204_v4  ;;  %v208_v12 = vld [vmem:[#allocation8 + $0x20] sm:$0xff]  ;;  %v209_v13 = vld [vmem:[#allocation8 + $0x28] sm:$0xff]  ;;  %v1559_v34 = vmov 5   ;;  %v1560_v35 = vmov 7   ;;  %v1561_v42 = vmov 6  }
  0x92   :  { %163 = vperm.xlu1 %1320, %v1764_v3   ;;  %149 = vperm.xlu0 %1318, %v1764_v3   ;;  %v1140_v9 = vpack.c.bf16 %v207_v7, %v206_v6  ;;  %v1772_v14 = vld [vmem:[#allocation5] sm:$0xff]  ;;  %v1143_v15 = vpack.c.bf16 %v209_v13, %v208_v12  ;;  %v211_v18 = vld [vmem:[#allocation8 + $0x38] sm:$0xff]  ;;  %v334_v19 = vld [vmem:[#allocation10] sm:$0xff]  ;;  %vm1562_vm0 = vmmov 0   ;;  %v1563_v52 = vmov 0.0   ;;  %s1564_s25 = smov [#allocation16]  }
  0x93   :  { %1138 = vmatpush3.bf16.msra.mxu0 %v1137_v8  ;;  %v210_v16 = vld [vmem:[#allocation8 + $0x30] sm:$0xff]  ;;  %v335_v20 = vld [vmem:[#allocation10 + $0x8] sm:$0xff]  ;;  %v337_v24 = vld [vmem:[#allocation10 + $0x18] sm:$0xff]  ;;  %1028 = vmatprep.mubr.msk.f32.mxu0 %vm1562_vm0, %v1563_v52  ;;  %v1806_v63 = vand.u32 127, %v145_v60  ;;  %s828_s26 = sshll.u32 %s1564_s25, 4  ;;  %s829_s26 = int_to_ptr.vmem [resolvable:$true] %s828_s26 }
  0x94   :  { %1139 = vmatprep.subr.bf16.mxu0 %v1555_v2  ;;  %v1161_v21 = vpack.c.bf16 %v335_v20, %v334_v19  ;;  %v1146_v22 = vpack.c.bf16 %v211_v18, %v210_v16  ;;  %v336_v23 = vld [vmem:[#allocation10 + $0x10] sm:$0xff]  ;;  %v212_v25 = vld [vmem:[#allocation8 + $0x40] sm:$0xff]  ;;  %v213_v26 = vld [vmem:[#allocation8 + $0x48] sm:$0xff]  ;;  %1063 = vmatprep.mubr.msk.f32.mxu1 %vm1562_vm0, %v1563_v52  ;;  %p1514_p9 = scmp.lt.s32.totalorder %s829_s26, %s829_s26 }
  0x95   :  { %v1164_v27 = vpack.c.bf16 %v337_v24, %v336_v23  ;;  %v1149_v28 = vpack.c.bf16 %v213_v26, %v212_v25  ;;  %v338_v29 = vld [vmem:[#allocation10 + $0x20] sm:$0xff]  ;;  %v339_v30 = vld [vmem:[#allocation10 + $0x28] sm:$0xff]  ;;  %v214_v31 = vld [vmem:[#allocation8 + $0x50] sm:$0xff] }
  0x96   :  { %1321 = vset.pattern.permute.xlu1 %v1556_v10  ;;  %1319 = vset.pattern.permute.xlu0 %v1557_v11  ;;  %v215_v32 = vld [vmem:[#allocation8 + $0x58] sm:$0xff]  ;;  %v1167_v33 = vpack.c.bf16 %v339_v30, %v338_v29  ;;  %v340_v37 = vld [vmem:[#allocation10 + $0x30] sm:$0xff]  ;;  %v216_v39 = vld [vmem:[#allocation8 + $0x60] sm:$0xff] }
  0x97   :  { %170 = vperm.xlu1 %1321, %v1764_v3   ;;  %156 = vperm.xlu0 %1319, %v1764_v3   ;;  %v1152_v36 = vpack.c.bf16 %v215_v32, %v214_v31  ;;  %v341_v38 = vld [vmem:[#allocation10 + $0x38] sm:$0xff]  ;;  %v217_v40 = vld [vmem:[#allocation8 + $0x68] sm:$0xff]  ;;  %v342_v44 = vld [vmem:[#allocation10 + $0x40] sm:$0xff] }
  0x98   :  { %1141 = vmatpush3.bf16.msra.mxu0 %v1140_v9  ;;  %1162 = vmatpush3.bf16.msra.mxu1 %v1161_v21  ;;  %v1170_v41 = vpack.c.bf16 %v341_v38, %v340_v37  ;;  %v1155_v43 = vpack.c.bf16 %v217_v40, %v216_v39  ;;  %v343_v45 = vld [vmem:[#allocation10 + $0x48] sm:$0xff]  ;;  %v218_v46 = vld [vmem:[#allocation8 + $0x70] sm:$0xff]  ;;  %v219_v47 = vld [vmem:[#allocation8 + $0x78] sm:$0xff] }
  0x99   :  { %1142 = vmatprep.subr.bf16.mxu0 %v1555_v2  ;;  %1163 = vmatprep.subr.bf16.mxu1 %v1555_v2  ;;  %v1173_v48 = vpack.c.bf16 %v343_v45, %v342_v44  ;;  %v1158_v49 = vpack.c.bf16 %v219_v47, %v218_v46  ;;  %v344_v50 = vld [vmem:[#allocation10 + $0x50] sm:$0xff]  ;;  %v345_v51 = vld [vmem:[#allocation10 + $0x58] sm:$0xff]  ;;  %v346_v54 = vld [vmem:[#allocation10 + $0x60] sm:$0xff] }
  0x9a   :  { %v1176_v53 = vpack.c.bf16 %v345_v51, %v344_v50  ;;  %v347_v55 = vld [vmem:[#allocation10 + $0x68] sm:$0xff]  ;;  %v348_v57 = vld [vmem:[#allocation10 + $0x70] sm:$0xff]  ;;  %v349_v58 = vld [vmem:[#allocation10 + $0x78] sm:$0xff] }
  0x9b   :  { %1322 = vset.pattern.permute.xlu1 %v1558_v17  ;;  %1323 = vset.pattern.permute.xlu0 %v1554_v1  ;;  %v1179_v56 = vpack.c.bf16 %v347_v55, %v346_v54  ;;  %v1182_v59 = vpack.c.bf16 %v349_v58, %v348_v57  ;;  %v421_v21 = vld [vmem:[#allocation11] sm:$0xff]  ;;  %v423_v31 = vld [vmem:[#allocation11 + $0x10] sm:$0xff]  ;;  %v424_v32 = vld [vmem:[#allocation11 + $0x18] sm:$0xff] }
  0x9c   :  { %177 = vperm.xlu1 %1322, %v1764_v3   ;;  %293 = vperm.xlu0 %1323, %v1772_v14   ;;  %v426_v37 = vld [vmem:[#allocation11 + $0x28] sm:$0xff]  ;;  %v428_v44 = vld [vmem:[#allocation11 + $0x38] sm:$0xff]  ;;  %v516_v46 = vld [vmem:[#allocation13] sm:$0xff] }
  0x9d   :  { %1144 = vmatpush3.bf16.msra.mxu0 %v1143_v15  ;;  %1165 = vmatpush3.bf16.msra.mxu1 %v1164_v27  ;;  %v517_v47 = vld [vmem:[#allocation13 + $0x8] sm:$0xff]  ;;  %v429_v54 = vld [vmem:[#allocation11 + $0x40] sm:$0xff]  ;;  %v518_v57 = vld [vmem:[#allocation13 + $0x10] sm:$0xff] }
  0x9e   :  { %1145 = vmatprep.subr.bf16.mxu0 %v1555_v2  ;;  %1166 = vmatprep.subr.bf16.mxu1 %v1555_v2  ;;  %v430_v55 = vld [vmem:[#allocation11 + $0x48] sm:$0xff]  ;;  %v519_v58 = vld [vmem:[#allocation13 + $0x18] sm:$0xff] }
  0x9f   :  { %v1212_v60 = vpack.c.bf16 %v519_v58, %v518_v57  ;;  %v635_v57 = vld [vmem:[#allocation14 + $0xc8] sm:$0xff]  ;;  %v660_v58 = vld [vmem:[#allocation14 + $0x190] sm:$0xff] }
  0xa0   :  { %1324 = vset.pattern.permute.xlu1 %v1557_v11  ;;  %1326 = vset.pattern.permute.xlu0 %v1553_v0 }
  0xa1   :  { %300 = vperm.xlu1 %1324, %v1772_v14   ;;  %307 = vperm.xlu0 %1326, %v1772_v14  }
  0xa2   :  { %1147 = vmatpush3.bf16.msra.mxu0 %v1146_v22  ;;  %1168 = vmatpush3.bf16.msra.mxu1 %v1167_v33  ;;  %v422_v22 = vld [vmem:[#allocation11 + $0x8] sm:$0xff] }
  0xa3   :  { %1148 = vmatprep.subr.bf16.mxu0 %v1555_v2  ;;  %1169 = vmatprep.subr.bf16.mxu1 %v1555_v2  ;;  %v1185_v26 = vpack.c.bf16 %v422_v22, %v421_v21  ;;  %v530_v22 = vld [vmem:[#allocation13 + $0x70] sm:$0xff] }
  0xa5   :  { %1325 = vset.pattern.permute.xlu1 %v1559_v34  ;;  %1329 = vset.pattern.permute.xlu0 %v1560_v35 }
  0xa6   :  { %184 = vperm.xlu1 %1325, %v1764_v3   ;;  %198 = vperm.xlu0 %1329, %v1764_v3  }
  0xa7   :  { %1150 = vmatpush3.bf16.msra.mxu0 %v1149_v28  ;;  %1171 = vmatpush3.bf16.msra.mxu1 %v1170_v41 }
  0xa8   :  { %1151 = vmatprep.subr.bf16.mxu0 %v1555_v2  ;;  %1172 = vmatprep.subr.bf16.mxu1 %v1555_v2 }
  0xaa   :  { %1327 = vset.pattern.permute.xlu1 %v1561_v42  ;;  %1332 = vset.pattern.permute.xlu0 %v1559_v34 }
  0xab   :  { %191 = vperm.xlu1 %1327, %v1764_v3   ;;  %1153 = vmatpush3.bf16.msra.mxu0 %v1152_v36  ;;  %v425_v36 = vld [vmem:[#allocation11 + $0x20] sm:$0xff] }
  0xac   :  { %1154 = vmatprep.subr.bf16.mxu0 %v1555_v2  ;;  %1174 = vmatpush3.bf16.msra.mxu1 %v1173_v48  ;;  %v1191_v41 = vpack.c.bf16 %v426_v37, %v425_v36  ;;  %v613_v36 = vld [vmem:[#allocation14 + $0x18] sm:$0xff]  ;;  %v630_v37 = vld [vmem:[#allocation14 + $0xa0] sm:$0xff] }
  0xad   :  { %1175 = vmatprep.subr.bf16.mxu1 %v1555_v2 }
  0xaf   :  { %1328 = vset.pattern.permute.xlu1 %v1556_v10  ;;  %1156 = vmatpush3.bf16.msra.mxu0 %v1155_v43  ;;  %v427_v43 = vld [vmem:[#allocation11 + $0x30] sm:$0xff] }
  0xb0   :  { %314 = vperm.xlu1 %1328, %v1772_v14   ;;  %1157 = vmatprep.subr.bf16.mxu0 %v1555_v2  ;;  %v1194_v50 = vpack.c.bf16 %v428_v44, %v427_v43  ;;  %v632_v43 = vld [vmem:[#allocation14 + $0xb0] sm:$0xff]  ;;  %v633_v44 = vld [vmem:[#allocation14 + $0xb8] sm:$0xff] }
  0xb1   :  { %1177 = vmatpush3.bf16.msra.mxu1 %v1176_v53  ;;  %v1209_v53 = vpack.c.bf16 %v517_v47, %v516_v46  ;;  %v1244_v46 = vpack.c.bf16 %v633_v44, %v632_v43  ;;  %v659_v47 = vld [vmem:[#allocation14 + $0x188] sm:$0xff]  ;;  %v653_v43 = vld [vmem:[#allocation14 + $0x158] sm:$0xff] }
  0xb2   :  { %1178 = vmatprep.subr.bf16.mxu1 %v1555_v2 }
  0xb3   :  { %1159 = vmatpush3.bf16.msra.mxu0 %v1158_v49 }
  0xb4   :  { %1330 = vset.pattern.permute.xlu1 %v1558_v17  ;;  %1184 = vmatprep.subr.bf16.mxu0 %v1555_v2 }
  0xb5   :  { %321 = vperm.xlu1 %1330, %v1772_v14   ;;  %1180 = vmatpush3.bf16.msra.mxu1 %v1179_v56 }
  0xb6   :  { %1181 = vmatprep.subr.bf16.mxu1 %v1555_v2 }
  0xb9   :  { %1331 = vset.pattern.permute.xlu1 %v1559_v34  ;;  %1183 = vmatpush3.bf16.msra.mxu1 %v1182_v59  ;;  %v1188_v34 = vpack.c.bf16 %v424_v32, %v423_v31  ;;  %v1197_v59 = vpack.c.bf16 %v430_v55, %v429_v54  ;;  %v628_v31 = vld [vmem:[#allocation14 + $0x90] sm:$0xff]  ;;  %v629_v32 = vld [vmem:[#allocation14 + $0x98] sm:$0xff]  ;;  %v643_v54 = vld [vmem:[#allocation14 + $0x108] sm:$0xff] }
  0xba   :  { %328 = vperm.xlu1 %1331, %v1772_v14   ;;  %1208 = vmatprep.subr.bf16.mxu1 %v1555_v2  ;;  %v634_v55 = vld [vmem:[#allocation14 + $0xc0] sm:$0xff] }
 0x111   :  { %v164_v61 = vpop.permute.xlu1 %163  ;;  %v150_v62 = vpop.permute.xlu0 %149 }
 0x112   :  { %vm151_vm1 = vcmp.eq.s32.totalorder %v150_v62, %v1806_v63  ;;  %vm165_vm3 = vcmp.eq.s32.totalorder %v164_v61, %v1806_v63  ;;  %v431_v61 = vld [vmem:[#allocation11 + $0x50] sm:$0xff]  ;;  %v432_v62 = vld [vmem:[#allocation11 + $0x58] sm:$0xff] }
 0x113   :  { %v841_v3 = vsel %vm151_vm1, 1.0, %v1563_v52  ;;  %v843_v8 = vsel %vm165_vm3, 1.0, %v1563_v52 }
 0x116   :  { %v171_v0 = vpop.permute.xlu1 %170  ;;  %v157_v1 = vpop.permute.xlu0 %156 }
 0x117   :  { %vm158_vm2 = vcmp.eq.s32.totalorder %v157_v1, %v1806_v63  ;;  %vm172_vm4 = vcmp.eq.s32.totalorder %v171_v0, %v1806_v63  ;;  %v521_v0 = vld [vmem:[#allocation13 + $0x28] sm:$0xff]  ;;  %v1200_v1 = vpack.c.bf16 %v432_v62, %v431_v61  ;;  %v618_v62 = vld [vmem:[#allocation14 + $0x40] sm:$0xff] }
 0x118   :  { %v842_v4 = vsel %vm158_vm2, 1.0, %v1563_v52  ;;  %v844_v12 = vsel %vm172_vm4, 1.0, %v1563_v52 }
 0x119   :  { %v161_v7 = vadd.f32 %v842_v4, %v841_v3  ;;  %v433_v4 = vld [vmem:[#allocation11 + $0x60] sm:$0xff] }
 0x11b   :  { %v178_v5 = vpop.permute.xlu1 %177  ;;  %v294_v6 = vpop.permute.xlu0 %293  ;;  %v168_v10 = vadd.f32 %v843_v8, %v161_v7  ;;  %v523_v7 = vld [vmem:[#allocation13 + $0x38] sm:$0xff] }
 0x11c   :  { %vm179_vm5 = vcmp.eq.s32.totalorder %v178_v5, %v1806_v63  ;;  %vm295_vm9 = vcmp.eq.s32.totalorder %v294_v6, %v1806_v63  ;;  %v434_v5 = vld [vmem:[#allocation11 + $0x68] sm:$0xff]  ;;  %v522_v6 = vld [vmem:[#allocation13 + $0x30] sm:$0xff] }
 0x11d   :  { %v175_v13 = vadd.f32 %v844_v12, %v168_v10  ;;  %v845_v15 = vsel %vm179_vm5, 1.0, %v1563_v52  ;;  %v849_v27 = vsel %vm295_vm9, 1.0, %v1563_v52  ;;  %v1203_v8 = vpack.c.bf16 %v434_v5, %v433_v4  ;;  %v435_v10 = vld [vmem:[#allocation11 + $0x70] sm:$0xff]  ;;  %v525_v12 = vld [vmem:[#allocation13 + $0x48] sm:$0xff]  ;;  %v637_v5 = vld [vmem:[#allocation14 + $0xd8] sm:$0xff] }
 0x11e   :  { %v636_v4 = vld [vmem:[#allocation14 + $0xd0] sm:$0xff] }
 0x11f   :  { %v182_v18 = vadd.f32 %v845_v15, %v175_v13  ;;  %v526_v15 = vld [vmem:[#allocation13 + $0x50] sm:$0xff] }
 0x120   :  { %v301_v9 = vpop.permute.xlu1 %300  ;;  %v308_v11 = vpop.permute.xlu0 %307 }
 0x121   :  { %vm302_vm10 = vcmp.eq.s32.totalorder %v301_v9, %v1806_v63  ;;  %vm309_vm11 = vcmp.eq.s32.totalorder %v308_v11, %v1806_v63  ;;  %v1218_v9 = vpack.c.bf16 %v523_v7, %v522_v6  ;;  %v524_v11 = vld [vmem:[#allocation13 + $0x40] sm:$0xff]  ;;  %v1252_v7 = vpack.c.bf16 %v637_v5, %v636_v4  ;;  %v856_v5 = vld [vmem:[%s1887_s9] ss:$0 sm:$0xff]  ;;  %s1509_s9 = scalar_lea.vmem %s829_s26, 128 }
 0x122   :  { %v850_v28 = vsel %vm302_vm10, 1.0, %v1563_v52  ;;  %v851_v35 = vsel %vm309_vm11, 1.0, %v1563_v52  ;;  %p1510_p8 = scmp.ne.s32.totalorder %s829_s26, %s1509_s9  ;;  %p1515_p10 = scmp.lt.s32.totalorder %s1509_s9, %s1509_s9 }
 0x123   :  { %v305_v33 = vadd.f32 %v850_v28, %v849_v27  ;;  %v627_v27 = vld [vmem:[#allocation14 + $0x88] sm:$0xff]  ;;  %v610_v28 = vld [vmem:[#allocation14] sm:$0xff] }
 0x124   :  { %p1516_p11 = por %p1515_p10, %p1514_p9 }
 0x125   :  { %v185_v14 = vpop.permute.xlu1 %184  ;;  %v199_v16 = vpop.permute.xlu0 %198  ;;  %v312_v40 = vadd.f32 %v851_v35, %v305_v33  ;;  %v612_v35 = vld [vmem:[#allocation14 + $0x10] sm:$0xff] }
 0x126   :  { %vm186_vm6 = vcmp.eq.s32.totalorder %v185_v14, %v1806_v63  ;;  %vm200_vm7 = vcmp.eq.s32.totalorder %v199_v16, %v1806_v63  ;;  %v1221_v14 = vpack.c.bf16 %v525_v12, %v524_v11  ;;  %v527_v16 = vld [vmem:[#allocation13 + $0x58] sm:$0xff]  ;;  %v646_v12 = vld [vmem:[#allocation14 + $0x120] sm:$0xff]  ;;  %p1517_p12 = pnand %p1516_p11, %p1510_p8 }
 0x127   :  { %v846_v17 = vsel %vm186_vm6, 1.0, %v1563_v52  ;;  %v848_v24 = vsel %vm200_vm7, 1.0, %v1563_v52  ;;  %v621_v11 = vld [vmem:[#allocation14 + $0x58] sm:$0xff] }
 0x128   :  { %v189_v20 = vadd.f32 %v846_v17, %v182_v18  ;;  %v420_v17 = vld [vmem:[#allocation7] sm:$0xff]  ;;  %v1224_v18 = vpack.c.bf16 %v527_v16, %v526_v15  ;;  %v639_v15 = vld [vmem:[#allocation14 + $0xe8] sm:$0xff]  ;;  %v664_v16 = vld [vmem:[#allocation14 + $0x1b0] sm:$0xff] }
 0x12a   :  { %v192_v19 = vpop.permute.xlu1 %191 }
 0x12b   :  { %vm193_vm8 = vcmp.eq.s32.totalorder %v192_v19, %v1806_v63  ;;  %v528_v19 = vld [vmem:[#allocation13 + $0x60] sm:$0xff] }
 0x12c   :  { %v847_v23 = vsel %vm193_vm8, 1.0, %v1563_v52 }
 0x12d   :  { %v196_v25 = vadd.f32 %v847_v23, %v189_v20  ;;  %v529_v20 = vld [vmem:[#allocation13 + $0x68] sm:$0xff]  ;;  %v531_v23 = vld [vmem:[#allocation13 + $0x78] sm:$0xff] }
 0x12e   :  { %v1227_v21 = vpack.c.bf16 %v529_v20, %v528_v19  ;;  %v665_v19 = vld [vmem:[#allocation14 + $0x1b8] sm:$0xff]  ;;  %v622_v20 = vld [vmem:[#allocation14 + $0x60] sm:$0xff] }
 0x12f   :  { %v203_v29 = vadd.f32 %v848_v24, %v196_v25  ;;  %v315_v30 = vpop.permute.xlu1 %314  ;;  %v1230_v24 = vpack.c.bf16 %v531_v23, %v530_v22  ;;  %v515_v25 = vld [vmem:[%s1881_s3] sm:$0xff]  ;;  %v1276_v22 = vpack.c.bf16 %v665_v19, %v664_v16 }
 0x130   :  { %vm316_vm12 = vcmp.eq.s32.totalorder %v315_v30, %v1806_v63  ;;  %v611_v30 = vld [vmem:[#allocation14 + $0x8] sm:$0xff] }
 0x131   :  { %1029 = vmatmul.mubr.f32.vlgmr.msra.gmra.mrb[0].mxu0 %v203_v29  ;;  %v852_v39 = vsel %vm316_vm12, 1.0, %v1563_v52  ;;  %v1234_v33 = vpack.c.bf16 %v611_v30, %v610_v28  ;;  %v623_v23 = vld [vmem:[#allocation14 + $0x68] sm:$0xff]  ;;  %v640_v28 = vld [vmem:[#allocation14 + $0xf0] sm:$0xff]  ;;  %v666_v30 = vld [vmem:[#allocation14 + $0x1c0] sm:$0xff] }
 0x132   :  { %1186 = vmatpush3.bf16.msra.mxu0 %v1185_v26  ;;  %1098 = vmatprep.mubr.msk.f32.mxu0 %vm1562_vm0, %v1563_v52  ;;  %v319_v45 = vadd.f32 %v852_v39, %v312_v40  ;;  %v626_v26 = vld [vmem:[#allocation14 + $0x80] sm:$0xff] }
 0x133   :  { %1187 = vmatprep.subr.bf16.mxu0 %v1555_v2  ;;  %v1232_v29 = vpack.c.bf16 %v627_v27, %v626_v26  ;;  %v614_v40 = vld [vmem:[#allocation14 + $0x20] sm:$0xff]  ;;  %v1258_v26 = vpack.c.bf16 %v623_v23, %v622_v20 }
 0x134   :  { %v322_v38 = vpop.permute.xlu1 %321 }
 0x135   :  { %vm323_vm13 = vcmp.eq.s32.totalorder %v322_v38, %v1806_v63  ;;  %v631_v38 = vld [vmem:[#allocation14 + $0xa8] sm:$0xff] }
 0x136   :  { %1189 = vmatpush3.bf16.msra.mxu0 %v1188_v34  ;;  %v853_v42 = vsel %vm323_vm13, 1.0, %v1563_v52  ;;  %v1236_v34 = vpack.c.bf16 %v629_v32, %v628_v31  ;;  %v1240_v39 = vpack.c.bf16 %v631_v38, %v630_v37  ;;  %v667_v32 = vld [vmem:[#allocation14 + $0x1c8] sm:$0xff] }
 0x137   :  { %1190 = vmatprep.subr.bf16.mxu0 %v1555_v2  ;;  %v326_v49 = vadd.f32 %v853_v42, %v319_v45  ;;  %v658_v45 = vld [vmem:[#allocation14 + $0x180] sm:$0xff]  ;;  %v651_v37 = vld [vmem:[#allocation14 + $0x148] sm:$0xff] }
 0x139   :  { %v329_v48 = vpop.permute.xlu1 %328 }
 0x13a   :  { %vm330_vm14 = vcmp.eq.s32.totalorder %v329_v48, %v1806_v63  ;;  %1192 = vmatpush3.bf16.msra.mxu0 %v1191_v41  ;;  %v520_v63 = vld [vmem:[#allocation13 + $0x20] sm:$0xff]  ;;  %v615_v41 = vld [vmem:[#allocation14 + $0x28] sm:$0xff]  ;;  %v616_v48 = vld [vmem:[#allocation14 + $0x30] sm:$0xff] }
 0x13b   :  { %v854_v51 = vsel %vm330_vm14, 1.0, %v1563_v52  ;;  %1193 = vmatprep.subr.bf16.mxu0 %v1555_v2  ;;  %v1215_v3 = vpack.c.bf16 %v521_v0, %v520_v63  ;;  %v1242_v42 = vpack.c.bf16 %v615_v41, %v614_v40  ;;  %v619_v63 = vld [vmem:[#allocation14 + $0x48] sm:$0xff]  ;;  %v644_v0 = vld [vmem:[#allocation14 + $0x110] sm:$0xff]  ;;  %v669_v40 = vld [vmem:[#allocation14 + $0x1d8] sm:$0xff] }
 0x13c   :  { %v333_v56 = vadd.f32 %v854_v51, %v326_v49  ;;  %v617_v49 = vld [vmem:[#allocation14 + $0x38] sm:$0xff] }
 0x13d   :  { %v1246_v51 = vpack.c.bf16 %v617_v49, %v616_v48  ;;  %v655_v49 = vld [vmem:[#allocation14 + $0x168] sm:$0xff] }
 0x13e   :  { %1195 = vmatpush3.bf16.msra.mxu0 %v1194_v50  ;;  %1064 = vmatmul.mubr.f32.vlgmr.msra.gmra.mrb[0].mxu1 %v333_v56  ;;  %v1264_v50 = vpack.c.bf16 %v659_v47, %v658_v45  ;;  %v670_v45 = vld [vmem:[#allocation14 + $0x1e0] sm:$0xff] }
 0x13f   :  { %1210 = vmatpush3.bf16.msra.mxu1 %v1209_v53  ;;  %1196 = vmatprep.subr.bf16.mxu0 %v1555_v2  ;;  %v642_v53 = vld [vmem:[#allocation14 + $0x100] sm:$0xff] }
 0x140   :  { %1211 = vmatprep.subr.bf16.mxu1 %v1555_v2  ;;  %1133 = vmatprep.mubr.msk.f32.mxu1 %vm1562_vm0, %v1563_v52  ;;  %v436_v52 = vld [vmem:[#allocation11 + $0x78] sm:$0xff]  ;;  %v1266_v56 = vpack.c.bf16 %v643_v54, %v642_v53  ;;  %v654_v47 = vld [vmem:[#allocation14 + $0x160] sm:$0xff] }
 0x141   :  { %v1206_v13 = vpack.c.bf16 %v436_v52, %v435_v10  ;;  %v620_v10 = vld [vmem:[#allocation14 + $0x50] sm:$0xff]  ;;  %v673_v53 = vld [vmem:[#allocation14 + $0x1f8] sm:$0xff] }
 0x142   :  { %1198 = vmatpush3.bf16.msra.mxu0 %v1197_v59  ;;  %v661_v59 = vld [vmem:[#allocation14 + $0x198] sm:$0xff] }
 0x143   :  { %1213 = vmatpush3.bf16.msra.mxu1 %v1212_v60  ;;  %1199 = vmatprep.subr.bf16.mxu0 %v1555_v2  ;;  %v1248_v60 = vpack.c.bf16 %v635_v57, %v634_v55  ;;  %v1268_v61 = vpack.c.bf16 %v661_v59, %v660_v58  ;;  %v656_v55 = vld [vmem:[#allocation14 + $0x170] sm:$0xff] }
 0x144   :  { %1214 = vmatprep.subr.bf16.mxu1 %v1555_v2 }
 0x146   :  { %1201 = vmatpush3.bf16.msra.mxu0 %v1200_v1  ;;  %v1250_v1 = vpack.c.bf16 %v619_v63, %v618_v62  ;;  %v855_v62 = vld [vmem:[%s1885_s7] ss:$0 sm:$0xff] }
 0x147   :  { %1216 = vmatpush3.bf16.msra.mxu1 %v1215_v3  ;;  %1202 = vmatprep.subr.bf16.mxu0 %v1555_v2  ;;  %v645_v3 = vld [vmem:[#allocation14 + $0x118] sm:$0xff] }
 0x148   :  { %1217 = vmatprep.subr.bf16.mxu1 %v1555_v2  ;;  %v1270_v6 = vpack.c.bf16 %v645_v3, %v644_v0 }
 0x14a   :  { %1204 = vmatpush3.bf16.msra.mxu0 %v1203_v8  ;;  %v662_v8 = vld [vmem:[#allocation14 + $0x1a0] sm:$0xff] }
 0x14b   :  { %1219 = vmatpush3.bf16.msra.mxu1 %v1218_v9  ;;  %1205 = vmatprep.subr.bf16.mxu0 %v1555_v2  ;;  %v663_v9 = vld [vmem:[#allocation14 + $0x1a8] sm:$0xff] }
 0x14c   :  { %1220 = vmatprep.subr.bf16.mxu1 %v1555_v2  ;;  %v1272_v52 = vpack.c.bf16 %v663_v9, %v662_v8 }
 0x14e   :  { %1207 = vmatpush3.bf16.msra.mxu0 %v1206_v13  ;;  %v647_v13 = vld [vmem:[#allocation14 + $0x128] sm:$0xff] }
 0x14f   :  { %1222 = vmatpush3.bf16.msra.mxu1 %v1221_v14  ;;  %1233 = vmatprep.subr.bf16.mxu0 %v1232_v29  ;;  %v638_v14 = vld [vmem:[#allocation14 + $0xe0] sm:$0xff]  ;;  %v641_v29 = vld [vmem:[#allocation14 + $0xf8] sm:$0xff] }
 0x150   :  { %1223 = vmatprep.subr.bf16.mxu1 %v1555_v2  ;;  %v1260_v31 = vpack.c.bf16 %v641_v29, %v640_v28 }
 0x151   :  { %1099 = vmatmul.mubr.f32.vlgmr.msra.gmra.mrb[2].mxu0 %v420_v17  ;;  %v1254_v17 = vpack.c.bf16 %v621_v11, %v620_v10 }
 0x152   :  { %1235 = vmatpush3.bf16.msra.mxu0 %v1234_v33  ;;  %v624_v33 = vld [vmem:[#allocation14 + $0x70] sm:$0xff] }
 0x153   :  { %1225 = vmatpush3.bf16.msra.mxu1 %v1224_v18  ;;  %1237 = vmatprep.subr.bf16.mxu0 %v1236_v34  ;;  %v1274_v18 = vpack.c.bf16 %v647_v13, %v646_v12  ;;  %v625_v34 = vld [vmem:[#allocation14 + $0x78] sm:$0xff]  ;;  %v857_v12 = vld [vmem:[%s1889_s11] ss:$0 sm:$0xff] }
 0x154   :  { %1226 = vmatprep.subr.bf16.mxu1 %v1555_v2 }
 0x157   :  { %1228 = vmatpush3.bf16.msra.mxu1 %v1227_v21  ;;  %v1256_v21 = vpack.c.bf16 %v639_v15, %v638_v14 }
 0x158   :  { %1229 = vmatprep.subr.bf16.mxu1 %v1555_v2  ;;  %v1238_v2 = vpack.c.bf16 %v613_v36, %v612_v35  ;;  %v1280_v35 = vpack.c.bf16 %v667_v32, %v666_v30  ;;  %v1262_v36 = vpack.c.bf16 %v625_v34, %v624_v33 }
 0x15a   :  { %1239 = vmatpush3.bf16.msra.mxu0 %v1238_v2  ;;  %v650_v2 = vld [vmem:[#allocation14 + $0x140] sm:$0xff] }
 0x15b   :  { %1231 = vmatpush3.bf16.msra.mxu1 %v1230_v24  ;;  %1241 = vmatprep.subr.bf16.mxu0 %v1240_v39  ;;  %v648_v24 = vld [vmem:[#allocation14 + $0x130] sm:$0xff]  ;;  %v1282_v38 = vpack.c.bf16 %v651_v37, %v650_v2 }
 0x15c   :  { %1265 = vmatprep.subr.bf16.mxu1 %v1264_v50  ;;  %v668_v39 = vld [vmem:[#allocation14 + $0x1d0] sm:$0xff]  ;;  %v1290_v50 = vpack.c.bf16 %v655_v49, %v654_v47 }
 0x15d   :  { %v1284_v41 = vpack.c.bf16 %v669_v40, %v668_v39 }
 0x15e   :  { %1134 = vmatmul.mubr.f32.vlgmr.msra.gmra.mrb[2].mxu1 %v515_v25  ;;  %1243 = vmatpush3.bf16.msra.mxu0 %v1242_v42  ;;  %v649_v25 = vld [vmem:[#allocation14 + $0x138] sm:$0xff]  ;;  %v652_v42 = vld [vmem:[#allocation14 + $0x150] sm:$0xff] }
 0x15f   :  { %1245 = vmatprep.subr.bf16.mxu0 %v1244_v46  ;;  %1267 = vmatpush3.bf16.msra.mxu1 %v1266_v56  ;;  %v1278_v27 = vpack.c.bf16 %v649_v25, %v648_v24  ;;  %v1286_v44 = vpack.c.bf16 %v653_v43, %v652_v42  ;;  %v671_v46 = vld [vmem:[#allocation14 + $0x1e8] sm:$0xff]  ;;  %v657_v56 = vld [vmem:[#allocation14 + $0x178] sm:$0xff] }
 0x160   :  { %1269 = vmatprep.subr.bf16.mxu1 %v1268_v61  ;;  %v1288_v48 = vpack.c.bf16 %v671_v46, %v670_v45  ;;  %v1294_v57 = vpack.c.bf16 %v657_v56, %v656_v55 }
 0x162   :  { %1247 = vmatpush3.bf16.msra.mxu0 %v1246_v51  ;;  %v672_v51 = vld [vmem:[#allocation14 + $0x1f0] sm:$0xff] }
 0x163   :  { %1249 = vmatprep.subr.bf16.mxu0 %v1248_v60  ;;  %1271 = vmatpush3.bf16.msra.mxu1 %v1270_v6  ;;  %v1292_v54 = vpack.c.bf16 %v673_v53, %v672_v51 }
 0x164   :  { %1273 = vmatprep.subr.bf16.mxu1 %v1272_v52 }
 0x166   :  { %1251 = vmatpush3.bf16.msra.mxu0 %v1250_v1 }
 0x167   :  { %1253 = vmatprep.subr.bf16.mxu0 %v1252_v7  ;;  %1275 = vmatpush3.bf16.msra.mxu1 %v1274_v18 }
 0x168   :  { %1277 = vmatprep.subr.bf16.mxu1 %v1276_v22 }
 0x16a   :  { %1255 = vmatpush3.bf16.msra.mxu0 %v1254_v17 }
 0x16b   :  { %1257 = vmatprep.subr.bf16.mxu0 %v1256_v21  ;;  %1279 = vmatpush3.bf16.msra.mxu1 %v1278_v27 }
 0x16c   :  { %1281 = vmatprep.subr.bf16.mxu1 %v1280_v35 }
 0x16e   :  { %1259 = vmatpush3.bf16.msra.mxu0 %v1258_v26 }
 0x16f   :  { %1261 = vmatprep.subr.bf16.mxu0 %v1260_v31  ;;  %1283 = vmatpush3.bf16.msra.mxu1 %v1282_v38 }
 0x170   :  { %1285 = vmatprep.subr.bf16.mxu1 %v1284_v41 }
 0x172   :  { %1263 = vmatpush3.bf16.msra.mxu0 %v1262_v36 }
 0x173   :  { %1287 = vmatpush3.bf16.msra.mxu1 %v1286_v44 }
 0x174   :  { %1289 = vmatprep.subr.bf16.mxu1 %v1288_v48 }
 0x177   :  { %1291 = vmatpush3.bf16.msra.mxu1 %v1290_v50 }
 0x178   :  { %1293 = vmatprep.subr.bf16.mxu1 %v1292_v54 }
 0x17b   :  { %1295 = vmatpush3.bf16.msra.mxu1 %v1294_v57 }
 0x204   :  { %v286_v58 = vpop.f32.mrb[0].mxu0 }
 0x205   :  { %v1030_v59 = vpop.f32.mrb[1].mxu0  ;;  %v290_v4 = vmul.f32 0.125, %v286_v58 }
 0x211   :  { %v416_v60 = vpop.f32.mrb[0].mxu1 }
 0x212   :  { %v1065_v61 = vpop.f32.mrb[1].mxu1  ;;  %815 = vmatprep.mubr.f32.mxu1 %v416_v60 }
 0x224   :  { %v510_v63 = vpop.f32.mrb[2].mxu0 }
 0x225   :  { %v511_v0 = vadd.f32 %v855_v62, %v510_v63  ;;  %v1100_v1 = vpop.f32.mrb[3].mxu0 }
 0x227   :  { %v514_v3 = vmax.f32 %v511_v0, 0.0 }
 0x229   :  { %745 = vmatprep.mubr.f32.mxu0 %v514_v3 }
 0x22a   :  { %746 = vmatmul.mubr.f32.vlgmr.msra.gmra.mrb[4].mxu0 %v290_v4 }
 0x231   :  { %v605_v6 = vpop.f32.mrb[2].mxu1 }
 0x232   :  { %v606_v7 = vadd.f32 %v856_v5, %v605_v6  ;;  %v1135_v8 = vpop.f32.mrb[3].mxu1 }
 0x234   :  { %v609_v9 = vmax.f32 %v606_v7, 0.0 }
 0x236   :  { %816 = vmatmul.mubr.f32.vlgmr.msra.gmra.mrb[4].mxu1 %v609_v9 }
 0x2fd   :  { %v958_v10 = vpop.f32.mrb[4].mxu0 }
 0x2fe   :  { %v959_v52 = vpop.f32.mrb[5].mxu0 }
 0x2ff   :  { %v960_v11 = vadd.f32 %v959_v52, %v958_v10 }
 0x301   :  { %v748_v15 = vadd.f32 %v960_v11, %v857_v12 }
 0x309   :  { %v993_v13 = vpop.f32.mrb[4].mxu1 }
 0x30a   :  { %v994_v14 = vpop.f32.mrb[5].mxu1 }
 0x30b   :  { %v995_v16 = vadd.f32 %v994_v14, %v993_v13 }
 0x30d   :  { %v818_v17 = vadd.f32 %v995_v16, %v748_v15 }
 0x30f   :  { %821 = vst [vmem:[#allocation16] sm:$0xff] %v818_v17 }
 0x310   :  { %1520 = shalt.err (!%p1517_p12)
}
 0x311   :  { %s1521_s11 = scalar_lea.hbm %s1890_s12, 128 }
 0x312   :  { %p1522_p13 = scmp.ne.s32.totalorder %s1890_s12, %s1521_s11  ;;  %p1525_p0 = scmp.lt.u32.totalorder %s1521_s11, %s1890_s12 }
 0x314   :  { %p1527_p1 = pnand %p1525_p0, %p1522_p13 }
 0x316   :  { %1530 = shalt.err (!%p1527_p1)
}
 0x317   :  { %831 = dma.vmem_to_hbm [thread:$0]  %s829_s26, 128, %s1890_s12, [#allocation4]  }
 0x318   :  { %1541 = dma.done.wait [#allocation4], 128  }
 0x319   :  { %1542 = vsyncadd [#allocation4], 4294967168 }
 0x31a   :  { %835 = vsyncpa [#allocation3], 1 }
 0x31b   :  { %836 = vsyncpa [#allocation6], 1 }
 0x31c   :  { %837 = vsyncpa [#allocation9], 1 }
 0x31d   :  { %838 = vsyncpa [#allocation12], 1 }
 0x31e   :  { %839 = vsyncpa [#allocation15], 1 }
 0x31f   :  { %840 = vsyncpa [#allocation4], 1 }

</bundles_post_ra>
